<compile_context>
chip_gen: v7x
topology: tpu7x:2x2x1
jax: 0.10.0
libtpu: 0.0.40
codegen_flags: <defaults>
</compile_context>

<pallas_src>
import math
import functools

import jax
import jax.numpy as jnp
import numpy as np
from jax import lax
from jax.experimental import pallas as pl
from jax.experimental.pallas import tpu as pltpu


# ----------------------------- configuration ------------------------------
class Args:
    n_agents = 2
    rnn_hidden_dim = 32      # emb_dim of the attention module
    final_msg_dim = 8        # msg_dim
    msg_cut = True
    compression_rate = 0.5


INPUT_SHAPE = 16             # per-agent observation/feature size
EP_NUM = 4                   # batch = EP_NUM * n_agents

LANE = 128                   # lane-aligned slot width inside the packed slabs


# ------------------------------ Pallas kernel ------------------------------
def _arcomm_kernel(in_dim, H, cut, slot,
                   x_ref, w_ref, b_ref, out_ref):
    x = x_ref[...]                                              # (B, in)

    # --- fused x-projection: [fc1 | w_keys | w_values] in one MXU push ---
    w_x = w_ref[0:in_dim, 0:3 * H]                              # (in, 3H)
    xp = jnp.dot(x, w_x, preferred_element_type=jnp.float32) + b_ref[:, 0:3 * H]
    x1 = jnp.maximum(xp[:, 0:H], 0.0)                           # relu(fc1(x))
    keys = xp[:, H:2 * H]                                       # w_keys(x)
    values = xp[:, 2 * H:3 * H]                                 # w_values(x)

    # --- fc2 -> relu ---
    x2 = jnp.dot(x1, w_ref[0:H, slot:slot + H],
                 preferred_element_type=jnp.float32) + b_ref[:, slot:slot + H]
    x2 = jnp.maximum(x2, 0.0)

    # --- queries: fc3 and w_queries fused, attention scale pre-folded ---
    q = jnp.dot(x2, w_ref[0:H, 2 * slot:2 * slot + H],
                preferred_element_type=jnp.float32) + b_ref[:, 2 * slot:2 * slot + H]

    # --- (B, B) attention logits without materializing keys.T ---
    logits = lax.dot_general(q, keys, (((1,), (1,)), ((), ())),
                             preferred_element_type=jnp.float32)
    logits = logits - jnp.max(logits, axis=-1, keepdims=True)
    p = jnp.exp(logits)
    denom = jnp.sum(p, axis=-1, keepdims=True)
    r = pl.reciprocal(denom, approx=True)                       # EUP slot
    r = r * (2.0 - denom * r)                                   # one Newton step -> ~f32 accuracy
    p = p * r

    att = jnp.dot(p, values, preferred_element_type=jnp.float32)   # (B, H)

    # --- fc_f, DCT-II and msg_cut fused into a single (H, cut) projection ---
    out_ref[...] = (jnp.dot(att, w_ref[0:H, 3 * slot:3 * slot + cut],
                            preferred_element_type=jnp.float32)
                    + b_ref[:, 3 * slot:3 * slot + cut])


def arcomm_forward(inputs, w_packed, b_packed, in_dim, args):
    B, _ = inputs.shape
    H = args.rnn_hidden_dim
    msg = args.final_msg_dim
    cut = int(msg * (1.0 - args.compression_rate)) if args.msg_cut else msg

    m = pl.pallas_call(
        functools.partial(_arcomm_kernel, in_dim, H, cut, LANE),
        out_shape=jax.ShapeDtypeStruct((B, cut), jnp.float32),
        grid=(1,),
        in_specs=[
            pl.BlockSpec(inputs.shape, lambda i: (0, 0)),
            pl.BlockSpec(w_packed.shape, lambda i: (0, 0)),
            pl.BlockSpec(b_packed.shape, lambda i: (0, 0)),
        ],
        out_specs=pl.BlockSpec((B, cut), lambda i: (0, 0)),
    )(inputs, w_packed, b_packed)

    # glue: only a reshape remains (msg_cut slice already done in-kernel).
    return m.reshape(-1, args.n_agents, cut)


# --------------------------- parameter construction ------------------------
def make_linear(key, in_dim, out_dim):
    """Deterministic init mimicking nn.Linear; weight stored as (in, out)."""
    kw, kb = jax.random.split(key)
    bound = 1.0 / math.sqrt(in_dim)
    w = jax.random.uniform(kw, (in_dim, out_dim), jnp.float32, -bound, bound)
    b = jax.random.uniform(kb, (1, out_dim), jnp.float32, -bound, bound)
    return w, b


def make_dct_matrix(n):
    """D[j, k] = 2*cos(pi*(2j+1)*k/(2n)); y = x @ D is the (unnormalized) DCT-II."""
    j = np.arange(n)[:, None]
    k = np.arange(n)[None, :]
    d = 2.0 * np.cos(np.pi * (2 * j + 1) * k / (2.0 * n))
    return jnp.asarray(d, dtype=jnp.float32)


def init_params(key, input_shape, args):
    keys = jax.random.split(key, 7)
    H, msg = args.rnn_hidden_dim, args.final_msg_dim
    w1, b1 = make_linear(keys[0], input_shape, H)
    w2, b2 = make_linear(keys[1], H, H)
    w3, b3 = make_linear(keys[2], H, msg)
    wk, bk = make_linear(keys[3], input_shape, H)
    wq, bq = make_linear(keys[4], msg, H)
    wv, bv = make_linear(keys[5], input_shape, H)
    wf, bf = make_linear(keys[6], H, msg)
    return dict(w1=w1, b1=b1, w2=w2, b2=b2, w3=w3, b3=b3,
                wk=wk, bk=bk, wq=wq, bq=bq, wv=wv, bv=bv,
                wf=wf, bf=bf, dct=make_dct_matrix(msg))


def pack_params(params, input_shape, args):
    """Algebraic fusion + packing into one weight slab and one bias row.

    Slot layout (each slot is LANE=128 lanes wide, lane-aligned):
      slot 0: [fc1 | w_keys | w_values]  (in_dim rows, 3H cols)
      slot 1: fc2                        (H rows, H cols)
      slot 2: fc3 @ (wq * emb**-0.5)     (H rows, H cols)   -- queries, pre-scaled
      slot 3: (wf @ dct)[:, :cut]        (H rows, cut cols) -- fc_f + DCT + msg_cut
    """
    H, msg = args.rnn_hidden_dim, args.final_msg_dim
    cut = int(msg * (1.0 - args.compression_rate)) if args.msg_cut else msg
    assert 3 * H <= LANE and cut <= LANE, "packed slot width exceeded"

    scale = float(H) ** (-0.5)                      # (emb**-0.25)^2 folded once
    wq_s = params["wq"] * scale
    bq_s = params["bq"] * scale
    w3q = params["w3"] @ wq_s                       # fold fc3 into queries
    b3q = params["b3"] @ wq_s + bq_s
    wf_d = params["wf"] @ params["dct"]             # fold DCT into fc_f
    bf_d = params["bf"] @ params["dct"]
    wf_c, bf_c = wf_d[:, :cut], bf_d[:, :cut]       # fold msg_cut

    wx = jnp.concatenate([params["w1"], params["wk"], params["wv"]], axis=1)
    bx = jnp.concatenate([params["b1"], params["bk"], params["bv"]], axis=1)

    rows = ((max(input_shape, H) + 7) // 8) * 8
    Wp = jnp.zeros((rows, 4 * LANE), jnp.float32)
    Wp = Wp.at[0:input_shape, 0:3 * H].set(wx)
    Wp = Wp.at[0:H, LANE:LANE + H].set(params["w2"])
    Wp = Wp.at[0:H, 2 * LANE:2 * LANE + H].set(w3q)
    Wp = Wp.at[0:H, 3 * LANE:3 * LANE + cut].set(wf_c)

    bp = jnp.zeros((1, 4 * LANE), jnp.float32)
    bp = bp.at[:, 0:3 * H].set(bx)
    bp = bp.at[:, LANE:LANE + H].set(params["b2"])
    bp = bp.at[:, 2 * LANE:2 * LANE + H].set(b3q)
    bp = bp.at[:, 3 * LANE:3 * LANE + cut].set(bf_c)
    return Wp, bp


# ------------------------------ reference (JAX) -----------------------------
def reference_forward(inputs, params, args):
    relu = lambda v: jnp.maximum(v, 0.0)
    x1 = relu(inputs @ params["w1"] + params["b1"])
    x2 = relu(x1 @ params["w2"] + params["b2"])
    x3 = x2 @ params["w3"] + params["b3"]
    keys = inputs @ params["wk"] + params["bk"]
    queries = x3 @ params["wq"] + params["bq"]
    values = inputs @ params["wv"] + params["bv"]
    s = args.rnn_hidden_dim ** (-0.25)
    dot = jax.nn.softmax((queries * s) @ (keys * s).T, axis=-1)
    att_v = (dot @ values) @ params["wf"] + params["bf"]
    m = att_v @ params["dct"]
    if args.msg_cut:
        c = int(args.final_msg_dim * (1.0 - args.compression_rate))
        return m[..., :c].reshape(-1, args.n_agents, c)
    return m.reshape(-1, args.n_agents, args.final_msg_dim)


# ----------------------------------- main -----------------------------------
if __name__ == "__main__":
    args = Args()
    key = jax.random.PRNGKey(0)
    k_in, k_par = jax.random.split(key)

    B = EP_NUM * args.n_agents
    inputs = jax.random.normal(k_in, (B, INPUT_SHAPE), dtype=jnp.float32)
    params = init_params(k_par, INPUT_SHAPE, args)
    w_packed, b_packed = pack_params(params, INPUT_SHAPE, args)

    out = arcomm_forward(inputs, w_packed, b_packed, INPUT_SHAPE, args)
    out = jax.block_until_ready(out)

    ref = reference_forward(inputs, params, args)
    np.testing.assert_allclose(np.asarray(out), np.asarray(ref), rtol=1e-4, atol=1e-4)

    print("KERNEL_OK")
</pallas_src>

<mosaic_0001>
module attributes {stable_mosaic.version = 11 : i64} {
  func.func @_arcomm_kernel(%arg0: i32, %arg1: memref<8x16xf32, #tpu.memory_space<vmem>>, %arg2: memref<32x512xf32, #tpu.memory_space<vmem>>, %arg3: memref<1x512xf32, #tpu.memory_space<vmem>>, %arg4: memref<8x4xf32, #tpu.memory_space<vmem>>) attributes {dimension_semantics = [#tpu.dimension_semantics<arbitrary>], iteration_bounds = array<i64: 1>, scalar_prefetch = 0 : i64, scratch_operands = 0 : i64, tpu.core_type = #tpu.core_type<tc>, window_params = [{pipeline_mode = #tpu.pipeline_mode<synchronous>, transform_indices = @transform_0, window_bounds = array<i64: 8, 16>}, {pipeline_mode = #tpu.pipeline_mode<synchronous>, transform_indices = @transform_1, window_bounds = array<i64: 32, 512>}, {pipeline_mode = #tpu.pipeline_mode<synchronous>, transform_indices = @transform_2, window_bounds = array<i64: 1, 512>}, {pipeline_mode = #tpu.pipeline_mode<synchronous>, transform_indices = @transform_3, window_bounds = array<i64: 8, 4>}]} {
    %c0 = arith.constant 0 : index
    %c0_0 = arith.constant 0 : index
    %0 = vector.load %arg1[%c0, %c0_0] : memref<8x16xf32, #tpu.memory_space<vmem>>, vector<8x16xf32>
    %c0_1 = arith.constant 0 : index
    %c0_2 = arith.constant 0 : index
    %1 = vector.load %arg2[%c0_1, %c0_2] : memref<32x512xf32, #tpu.memory_space<vmem>>, vector<16x96xf32>
    %cst = arith.constant dense<0.000000e+00> : vector<8x96xf32>
    %2 = tpu.matmul %0, %1, %cst {dimension_numbers = #tpu.dot_dimension_numbers<[1], [0], [0], [1], [0, 0, 1, 1], [], []>} : vector<8x16xf32>, vector<16x96xf32>, vector<8x96xf32> -> vector<8x96xf32>
    %c0_3 = arith.constant 0 : index
    %c0_4 = arith.constant 0 : index
    %3 = vector.load %arg3[%c0_3, %c0_4] : memref<1x512xf32, #tpu.memory_space<vmem>>, vector<1x96xf32>
    %4 = vector.broadcast %3 : vector<1x96xf32> to vector<8x96xf32>
    %5 = arith.addf %2, %4 : vector<8x96xf32>
    %6 = vector.extract_strided_slice %5 {offsets = [0, 0], sizes = [8, 32], strides = [1, 1]} : vector<8x96xf32> to vector<8x32xf32>
    %cst_5 = arith.constant 0.000000e+00 : f32
    %7 = vector.broadcast %cst_5 : f32 to vector<8x32xf32>
    %8 = arith.maximumf %6, %7 : vector<8x32xf32>
    %9 = vector.extract_strided_slice %5 {offsets = [0, 32], sizes = [8, 32], strides = [1, 1]} : vector<8x96xf32> to vector<8x32xf32>
    %10 = vector.extract_strided_slice %5 {offsets = [0, 64], sizes = [8, 32], strides = [1, 1]} : vector<8x96xf32> to vector<8x32xf32>
    %c0_6 = arith.constant 0 : index
    %c128 = arith.constant 128 : index
    %11 = vector.load %arg2[%c0_6, %c128] : memref<32x512xf32, #tpu.memory_space<vmem>>, vector<32x32xf32>
    %cst_7 = arith.constant dense<0.000000e+00> : vector<8x32xf32>
    %12 = tpu.matmul %8, %11, %cst_7 {dimension_numbers = #tpu.dot_dimension_numbers<[1], [0], [0], [1], [0, 0, 1, 1], [], []>} : vector<8x32xf32>, vector<32x32xf32>, vector<8x32xf32> -> vector<8x32xf32>
    %c0_8 = arith.constant 0 : index
    %c128_9 = arith.constant 128 : index
    %13 = vector.load %arg3[%c0_8, %c128_9] : memref<1x512xf32, #tpu.memory_space<vmem>>, vector<1x32xf32>
    %14 = vector.broadcast %13 : vector<1x32xf32> to vector<8x32xf32>
    %15 = arith.addf %12, %14 : vector<8x32xf32>
    %cst_10 = arith.constant 0.000000e+00 : f32
    %16 = vector.broadcast %cst_10 : f32 to vector<8x32xf32>
    %17 = arith.maximumf %15, %16 : vector<8x32xf32>
    %c0_11 = arith.constant 0 : index
    %c256 = arith.constant 256 : index
    %18 = vector.load %arg2[%c0_11, %c256] : memref<32x512xf32, #tpu.memory_space<vmem>>, vector<32x32xf32>
    %cst_12 = arith.constant dense<0.000000e+00> : vector<8x32xf32>
    %19 = tpu.matmul %17, %18, %cst_12 {dimension_numbers = #tpu.dot_dimension_numbers<[1], [0], [0], [1], [0, 0, 1, 1], [], []>} : vector<8x32xf32>, vector<32x32xf32>, vector<8x32xf32> -> vector<8x32xf32>
    %c0_13 = arith.constant 0 : index
    %c256_14 = arith.constant 256 : index
    %20 = vector.load %arg3[%c0_13, %c256_14] : memref<1x512xf32, #tpu.memory_space<vmem>>, vector<1x32xf32>
    %21 = vector.broadcast %20 : vector<1x32xf32> to vector<8x32xf32>
    %22 = arith.addf %19, %21 : vector<8x32xf32>
    %cst_15 = arith.constant dense<0.000000e+00> : vector<8x8xf32>
    %23 = tpu.matmul %22, %9, %cst_15 {dimension_numbers = #tpu.dot_dimension_numbers<[1], [1], [0], [0], [0, 0, 1, 0], [], []>} : vector<8x32xf32>, vector<8x32xf32>, vector<8x8xf32> -> vector<8x8xf32>
    %cst_16 = arith.constant dense<0xFF800000> : vector<8xf32>
    %24 = vector.multi_reduction <maximumf>, %23, %cst_16 [1] : vector<8x8xf32> to vector<8xf32>
    %25 = vector.shape_cast %24 : vector<8xf32> to vector<8x1xf32>
    %26 = vector.broadcast %25 : vector<8x1xf32> to vector<8x8xf32>
    %27 = arith.subf %23, %26 : vector<8x8xf32>
    %28 = math.exp %27 : vector<8x8xf32>
    %cst_17 = arith.constant dense<0.000000e+00> : vector<8xf32>
    %29 = vector.multi_reduction <add>, %28, %cst_17 [1] : vector<8x8xf32> to vector<8xf32>
    %30 = vector.shape_cast %29 : vector<8xf32> to vector<8x1xf32>
    %31 = tpu.reciprocal %30 {approx = true} : vector<8x1xf32> -> vector<8x1xf32>
    %32 = arith.mulf %30, %31 : vector<8x1xf32>
    %cst_18 = arith.constant 2.000000e+00 : f32
    %33 = vector.broadcast %cst_18 : f32 to vector<8x1xf32>
    %34 = arith.subf %33, %32 : vector<8x1xf32>
    %35 = arith.mulf %31, %34 : vector<8x1xf32>
    %36 = vector.broadcast %35 : vector<8x1xf32> to vector<8x8xf32>
    %37 = arith.mulf %28, %36 : vector<8x8xf32>
    %cst_19 = arith.constant dense<0.000000e+00> : vector<8x32xf32>
    %38 = tpu.matmul %37, %10, %cst_19 {dimension_numbers = #tpu.dot_dimension_numbers<[1], [0], [0], [1], [0, 0, 1, 1], [], []>} : vector<8x8xf32>, vector<8x32xf32>, vector<8x32xf32> -> vector<8x32xf32>
    %c0_20 = arith.constant 0 : index
    %c384 = arith.constant 384 : index
    %39 = vector.load %arg2[%c0_20, %c384] : memref<32x512xf32, #tpu.memory_space<vmem>>, vector<32x4xf32>
    %cst_21 = arith.constant dense<0.000000e+00> : vector<8x4xf32>
    %40 = tpu.matmul %38, %39, %cst_21 {dimension_numbers = #tpu.dot_dimension_numbers<[1], [0], [0], [1], [0, 0, 1, 1], [], []>} : vector<8x32xf32>, vector<32x4xf32>, vector<8x4xf32> -> vector<8x4xf32>
    %c0_22 = arith.constant 0 : index
    %c384_23 = arith.constant 384 : index
    %41 = vector.load %arg3[%c0_22, %c384_23] : memref<1x512xf32, #tpu.memory_space<vmem>>, vector<1x4xf32>
    %42 = vector.broadcast %41 : vector<1x4xf32> to vector<8x4xf32>
    %43 = arith.addf %40, %42 : vector<8x4xf32>
    %c0_24 = arith.constant 0 : index
    %c0_25 = arith.constant 0 : index
    %44 = vector.load %arg4[%c0_24, %c0_25] : memref<8x4xf32, #tpu.memory_space<vmem>>, vector<8x4xf32>
    tpu.vector_store %arg4[%c0_24, %c0_25], %43 {strides = array<i32>} : memref<8x4xf32, #tpu.memory_space<vmem>>, vector<8x4xf32>,
    return
  }
  func.func @transform_0(%arg0: i32) -> (i32, i32) {
    %c0_i32 = arith.constant 0 : i32
    %c0_i32_0 = arith.constant 0 : i32
    %c0_i32_1 = arith.constant 0 : i32
    return %c0_i32, %c0_i32_0 : i32, i32
  }
  func.func @transform_1(%arg0: i32) -> (i32, i32) {
    %c0_i32 = arith.constant 0 : i32
    %c0_i32_0 = arith.constant 0 : i32
    %c0_i32_1 = arith.constant 0 : i32
    return %c0_i32, %c0_i32_0 : i32, i32
  }
  func.func @transform_2(%arg0: i32) -> (i32, i32) {
    %c0_i32 = arith.constant 0 : i32
    %c0_i32_0 = arith.constant 0 : i32
    %c0_i32_1 = arith.constant 0 : i32
    return %c0_i32, %c0_i32_0 : i32, i32
  }
  func.func @transform_3(%arg0: i32) -> (i32, i32) {
    %c0_i32 = arith.constant 0 : i32
    %c0_i32_0 = arith.constant 0 : i32
    %c0_i32_1 = arith.constant 0 : i32
    return %c0_i32, %c0_i32_0 : i32, i32
  }
}

</mosaic_0001>

<bundles_post_ra>
// kernel: tpu_custom_call.1
= control target key start
LH: loop header
LB: loop body
LE: loop exit
PB: predicated region body
PF: predicated region fallthrough
CT: control target
= control target key end

     0   :  { %8 = vsyncpa [#allocation3], 0  ;;  %s817_s0 = inlined_call_operand.hbm [shape: f32[8,16], index: 0, kind: input, shape index: {}]   ;;  %s818_s1 = inlined_call_operand.hbm [shape: f32[32,512], index: 1, kind: input, shape index: {}]   ;;  %s819_s2 = inlined_call_operand.vmem [shape: f32[1,512], index: 2, kind: input, shape index: {}]   ;;  %s820_s3 = inlined_call_operand.vmem [shape: f32[8,4], index: 3, kind: output, shape index: {}]  }
   0x1   :  { %9 = vsyncpa [#allocation5], 0  ;;  %s721_s12 = smov [#allocation2]   ;;  %s722_s14 = smov [#allocation4]  }
   0x2   :  { %s16_s13 = sshll.u32 %s721_s12, 4  ;;  %s25_s15 = sshll.u32 %s722_s14, 4  ;;  %s17_s13 = int_to_ptr.vmem [resolvable:$true] %s16_s13  ;;  %s750_s15 = int_to_ptr.vmem [resolvable:$true] %s25_s15 }
   0x3   :  { %s673_s18 = scalar_lea.hbm %s817_s0, 128 }
   0x4   :  { %p674_p0 = scmp.ne.s32.totalorder %s817_s0, %s673_s18  ;;  %p677_p1 = scmp.lt.u32.totalorder %s673_s18, %s817_s0 }
   0x6   :  { %p679_p2 = pnand %p677_p1, %p674_p0 }
   0x8   :  { %682 = shalt.err (!%p679_p2)
}
   0x9   :  { %s683_s23 = scalar_lea.vmem %s17_s13, 128  ;;  %p688_p4 = scmp.lt.s32.totalorder %s17_s13, %s17_s13 }
   0xa   :  { %p684_p3 = scmp.ne.s32.totalorder %s17_s13, %s683_s23  ;;  %p689_p5 = scmp.lt.s32.totalorder %s683_s23, %s683_s23 }
   0xc   :  { %p690_p6 = por %p689_p5, %p688_p4 }
   0xe   :  { %p691_p7 = pnand %p690_p6, %p684_p3 }
  0x10   :  { %694 = shalt.err (!%p691_p7)
}
  0x11   :  { %19 = dma.hbm_to_vmem [thread:$0]  %s817_s0, 128, %s17_s13, [#allocation3]  }
  0x12   :  { %s695_s28 = scalar_lea.hbm %s818_s1, 2048 }
  0x13   :  { %p696_p8 = scmp.ne.s32.totalorder %s818_s1, %s695_s28  ;;  %p699_p9 = scmp.lt.u32.totalorder %s695_s28, %s818_s1 }
  0x15   :  { %p701_p10 = pnand %p699_p9, %p696_p8 }
  0x17   :  { %704 = shalt.err (!%p701_p10)
}
  0x18   :  { %s705_s6 = scalar_lea.vmem %s750_s15, 2048  ;;  %p710_p12 = scmp.lt.s32.totalorder %s750_s15, %s750_s15 }
  0x19   :  { %p706_p11 = scmp.ne.s32.totalorder %s750_s15, %s705_s6  ;;  %p711_p13 = scmp.lt.s32.totalorder %s705_s6, %s705_s6 }
  0x1b   :  { %p712_p0 = por %p711_p13, %p710_p12 }
  0x1d   :  { %p713_p1 = pnand %p712_p0, %p706_p11 }
  0x1f   :  { %716 = shalt.err (!%p713_p1)
}
  0x20   :  { %s723_s0 = smov 512   ;;  %s724_s7 = smov 32  }
  0x21   :  { %31 = dma.hbm_to_vmem [thread:$0]  %s818_s1, 2048, %s750_s15, [#allocation5], %s723_s0, %s723_s0, %s724_s7  }
  0x22   :  { %717 = dma.done.wait [#allocation3], 128  }
  0x23   :  { %718 = vsyncadd [#allocation3], 4294967168 }
  0x24   :  { %719 = dma.done.wait [#allocation5], 2048  }
  0x25   :  { %720 = vsyncadd [#allocation5], 4294965248  ;;  %v725_v0 = vmov 0.0|0.0   ;;  %vm726_vm0 = vmmov 0   ;;  %v727_v1 = vmov 0.0   ;;  %v41_v2 = vld [vmem:[#allocation4] sm:$0xff] }
  0x26   :  { %639 = vmatprep.subr.bf16.mxu0 %v725_v0  ;;  %593 = vmatprep.mubr.msk.f32.mxu0 %vm726_vm0, %v727_v1  ;;  %v42_v3 = vld [vmem:[#allocation4 + $0x20] sm:$0xff]  ;;  %v125_v5 = vld [vmem:[#allocation4 + $0x8] sm:$0xff]  ;;  %v40_v8 = vld [vmem:[#allocation2] sm:$0xff]  ;;  %vm50_vm1 = vcmask 130048   ;;  %vm136_vm2 = vcmask 261120   ;;  %s728_s11 = smov 96  }
  0x27   :  { %642 = vmatprep.subr.bf16.mxu1 %v725_v0  ;;  %604 = vmatprep.mubr.msk.f32.mxu1 %vm726_vm0, %v727_v1  ;;  %v640_v4 = vpack.c.bf16 %v42_v3, %v41_v2  ;;  %v126_v6 = vld [vmem:[#allocation4 + $0x28] sm:$0xff]  ;;  %v211_v12 = vld [vmem:[#allocation4 + $0x10] sm:$0xff]  ;;  %vm373_vm3 = vcmask 64512   ;;  %s729_s16 = smov 64   ;;  %v464_v41 = vld [vmem:[#allocation4 + $0x18] sm:$0xff]  ;;  %vm548_vm4 = vcmask 31744  }
  0x28   :  { %v643_v7 = vpack.c.bf16 %v126_v6, %v125_v5  ;;  %v127_v9 = vld [vmem:[#allocation4 + $0x48] sm:$0xff]  ;;  %v212_v13 = vld [vmem:[#allocation4 + $0x30] sm:$0xff]  ;;  %v465_v42 = vld [vmem:[#allocation4 + $0x38] sm:$0xff] }
  0x29   :  { %641 = vmatpush3.bf16.msra.mxu0 %v640_v4  ;;  %v128_v10 = vld [vmem:[#allocation4 + $0x68] sm:$0xff]  ;;  %v649_v14 = vpack.c.bf16 %v212_v13, %v211_v12  ;;  %v556_v15 = vld [vmem:[%s819_s2] ss:$0 sm:$0xff]  ;;  %v558_v24 = vld [vmem:[%s819_s2 + $0x1] ss:$0 sm:$0xff]  ;;  %v655_v44 = vpack.c.bf16 %v465_v42, %v464_v41 }
  0x2a   :  { %644 = vmatpush3.bf16.msra.mxu1 %v643_v7  ;;  %648 = vmatprep.subr.bf16.mxu0 %v725_v0  ;;  %v646_v11 = vpack.c.bf16 %v128_v10, %v127_v9  ;;  %v213_v20 = vld [vmem:[#allocation4 + $0x50] sm:$0xff]  ;;  %v466_v43 = vld [vmem:[#allocation4 + $0x58] sm:$0xff] }
  0x2b   :  { %645 = vmatprep.subr.bf16.mxu1 %v725_v0  ;;  %v214_v21 = vld [vmem:[#allocation4 + $0x70] sm:$0xff]  ;;  %v467_v45 = vld [vmem:[#allocation4 + $0x78] sm:$0xff] }
  0x2c   :  { %594 = vmatmul.mubr.msk.f32.vlgmr.msra.gmra.mrb[0].mxu0 %vm50_vm1, %v40_v8  ;;  %v652_v22 = vpack.c.bf16 %v214_v21, %v213_v20  ;;  %v560_v29 = vld [vmem:[%s819_s2 + $0x2] ss:$0 sm:$0xff]  ;;  %v658_v46 = vpack.c.bf16 %v467_v45, %v466_v43  ;;  %v565_v56 = vld [vmem:[%s819_s2 + $0x3] ss:$0 sm:$0xff] }
  0x2d   :  { %615 = vmatprep.mubr.msk.f32.mxu0 %vm726_vm0, %v727_v1  ;;  %650 = vmatpush3.bf16.msra.mxu0 %v649_v14 }
  0x2e   :  { %647 = vmatpush3.bf16.msra.mxu1 %v646_v11  ;;  %651 = vmatprep.subr.bf16.mxu0 %v725_v0 }
  0x2f   :  { %618 = vmatprep.subr.mxu1 %v727_v1 }
  0x31   :  { %653 = vmatpush3.bf16.msra.mxu0 %v652_v22 }
  0x32   :  { %623 = vmatprep.subr.mxu0 %v727_v1 }
  0xff   :  { %v120_v16 = vpop.f32.mrb[0].mxu0 }
 0x100   :  { %v121_v17 = vadd.f32 %v556_v15, %v120_v16  ;;  %v595_v18 = vpop.f32.mrb[1].mxu0 }
 0x102   :  { %v124_v19 = vmax.f32 %v121_v17, 0.0  ;;  %296 = vrot.lane.b32.xlu0 %v121_v17, %s728_s11 }
 0x104   :  { %605 = vmatmul.mubr.msk.f32.vlgmr.msra.gmra.mrb[0].mxu1 %vm136_vm2, %v124_v19 }
 0x105   :  { %620 = vmatprep.mubr.msk.f32.mxu1 %vm726_vm0, %v727_v1 }
 0x174   :  { %v297_v23 = vpop.permute.xlu0 %296 }
 0x175   :  { %619 = vmatpush3.xpose.msk.msra.mxu1 %vm136_vm2, %v297_v23 }
 0x176   :  { %654 = vmatprep.subr.bf16.mxu1 %v725_v0 }
 0x1d7   :  { %v206_v25 = vpop.f32.mrb[0].mxu1 }
 0x1d8   :  { %v207_v26 = vadd.f32 %v558_v24, %v206_v25  ;;  %v606_v27 = vpop.f32.mrb[1].mxu1 }
 0x1da   :  { %v210_v28 = vmax.f32 %v207_v26, 0.0 }
 0x1dc   :  { %616 = vmatmul.mubr.msk.f32.vlgmr.msra.gmra.mrb[2].mxu0 %vm136_vm2, %v210_v28 }
 0x1dd   :  { %625 = vmatprep.mubr.msk.f32.mxu0 %vm726_vm0, %v727_v1 }
 0x2af   :  { %v291_v30 = vpop.f32.mrb[2].mxu0 }
 0x2b0   :  { %v292_v31 = vadd.f32 %v560_v29, %v291_v30  ;;  %v617_v32 = vpop.f32.mrb[3].mxu0 }
 0x2b2   :  { %621 = vmatmul.mubr.msk.f32.vlgmr.msra.gmra.mrb[2].mxu1 %vm136_vm2, %v292_v31 }
 0x2b3   :  { %636 = vmatprep.mubr.msk.f32.mxu1 %vm726_vm0, %v727_v1  ;;  %656 = vmatpush3.bf16.msra.mxu1 %v655_v44 }
 0x2b4   :  { %657 = vmatprep.subr.bf16.mxu1 %v725_v0 }
 0x2b7   :  { %659 = vmatpush3.bf16.msra.mxu1 %v658_v46 }
 0x385   :  { %v369_v33 = vpop.f32.mrb[2].mxu1 }
 0x386   :  { %v622_v34 = vpop.f32.mrb[3].mxu1  ;;  %v374_v35 = vsel %vm373_vm3, %v369_v33, -inf }
 0x387   :  { %375 = vmax.xlane.f32.xlu0 %v374_v35 }
 0x414   :  { %v376_v36 = vpop.xlane.xlu0 %375 }
 0x415   :  { %v377_v37 = vsub.f32 %v369_v33, %v376_v36 }
 0x417   :  { %v378_v38 = vmul.f32 1.442695, %v377_v37 }
 0x419   :  { %669 = vpow2.f32 %v378_v38 }
 0x423   :  { %v670_v39 = vpop.eup %669 }
 0x424   :  { %v380_v40 = vsel %vm373_vm3, %v670_v39, 0.0 }
 0x425   :  { %381 = vadd.xlane.f32.xlu1 %v380_v40 }
 0x436   :  { %388 = vrot.lane.b32.xlu1 %v121_v17, %s729_s16 }
 0x4b2   :  { %v382_v47 = vpop.xlane.xlu1 %381 }
 0x4b3   :  { %671 = vrcp.f32 %v382_v47 }
 0x4b6   :  { %v389_v48 = vpop.permute.xlu1 %388 }
 0x4b7   :  { %624 = vmatpush3.msra.mxu0 %v389_v48 }
 0x4bd   :  { %v672_v49 = vpop.eup %671 }
 0x4be   :  { %v384_v50 = vmul.f32 %v672_v49, %v382_v47 }
 0x4c0   :  { %v385_v51 = vsub.f32 2.0, %v384_v50 }
 0x4c2   :  { %v386_v52 = vmul.f32 %v672_v49, %v385_v51 }
 0x4c4   :  { %v387_v53 = vmul.f32 %v670_v39, %v386_v52 }
 0x4c6   :  { %626 = vmatmul.mubr.msk.f32.vlgmr.msra.gmra.mrb[4].mxu0 %vm373_vm3, %v387_v53 }
 0x599   :  { %v460_v54 = vpop.f32.mrb[4].mxu0 }
 0x59a   :  { %v627_v55 = vpop.f32.mrb[5].mxu0  ;;  %637 = vmatmul.mubr.msk.f32.vlgmr.msra.gmra.mrb[4].mxu1 %vm136_vm2, %v460_v54 }
 0x66d   :  { %v544_v57 = vpop.f32.mrb[4].mxu1 }
 0x66e   :  { %v545_v58 = vadd.f32 %v565_v56, %v544_v57  ;;  %v638_v59 = vpop.f32.mrb[5].mxu1 }
 0x670   :  { %549 = vst.msk [vmem:[%s820_s3] sm:$0xff] %vm548_vm4, %v545_v58 }
 0x671   :  { %554 = vsyncpa [#allocation3], 1 }
 0x672   :  { %555 = vsyncpa [#allocation5], 1 }

</bundles_post_ra>
